<compile_context>
chip_gen: v7x
topology: tpu7x:2x2x1
jax: 0.10.0
libtpu: 0.0.40
codegen_flags: <defaults>
</compile_context>

<pallas_src>
import jax
import jax.numpy as jnp
from jax.experimental import pallas as pl
from jax.experimental.pallas import tpu as pltpu


def _conv1x1_kernel(w_ref, x_ref, o_ref):
    # w_ref: (C_out, C_in)  -- resident across the whole grid
    # x_ref: (C_in, THW)    -- spatial tile, lanes = spatial
    # o_ref: (C_out, THW)
    o_ref[...] = jnp.dot(
        w_ref[...], x_ref[...], preferred_element_type=jnp.float32
    ).astype(o_ref.dtype)


def conv1x1(x_nchw, weight, *, use_bf16=False):
    """1x1 convolution, stride 1, no bias (NCHW in / NCHW out).

    Args:
      x_nchw: (N, C_in, H, W)
      weight: (C_out, C_in, 1, 1)  (PyTorch Conv2d weight layout)
      use_bf16: feed the MXU bf16 inputs (f32 accumulation).  Off by default.
    Returns:
      (N, C_out, H, W) with x_nchw.dtype
    """
    # TODO(synk): bias=True variant not implemented (module default is bias=False).
    n, c_in, h, w = x_nchw.shape
    c_out = weight.shape[0]
    hw = h * w
    out_dtype = x_nchw.dtype

    # NCHW -> (N, C_in, H*W): contiguous merge of the last two dims, no data movement.
    x_flat = x_nchw.reshape(n, c_in, hw)
    w_mat = weight[:, :, 0, 0]  # (C_out, C_in)

    if use_bf16:
        x_flat = x_flat.astype(jnp.bfloat16)
        w_mat = w_mat.astype(jnp.bfloat16)

    # ---- choose the spatial (lane-axis) tile ------------------------------------
    LANE = 128
    bytes_el = 2 if use_bf16 else 4
    # Double-buffered input + output tiles must fit comfortably in VMEM on every
    # generation (v7x scoped default is 32 MiB); keep them under ~16 MiB.
    vmem_budget = 16 * 1024 * 1024
    bytes_per_col = 2 * bytes_el * (c_in + c_out)
    max_thw = max(LANE, (vmem_budget // bytes_per_col) // LANE * LANE)

    hw_pad = pl.cdiv(hw, LANE) * LANE
    thw = min(hw_pad, 1024, max_thw)
    hw_pad = pl.cdiv(hw_pad, thw) * thw
    if hw_pad != hw:
        # Zero-pad spatial so the tile divides evenly; padded columns are sliced off.
        x_flat = jnp.pad(x_flat, ((0, 0), (0, 0), (0, hw_pad - hw)))

    grid = (n, hw_pad // thw)

    out_flat = pl.pallas_call(
        _conv1x1_kernel,
        out_shape=jax.ShapeDtypeStruct((n, c_out, hw_pad), out_dtype),
        grid_spec=pltpu.PrefetchScalarGridSpec(
            num_scalar_prefetch=0,
            grid=grid,
            in_specs=[
                # Weight: constant block index -> stays resident in VMEM.
                pl.BlockSpec((c_out, c_in), lambda b, s: (0, 0)),
                # Activation: one batch image, one spatial tile per grid step.
                pl.BlockSpec((None, c_in, thw), lambda b, s: (b, 0, s)),
            ],
            out_specs=pl.BlockSpec((None, c_out, thw), lambda b, s: (b, 0, s)),
        ),
        compiler_params=pltpu.CompilerParams(
            # Both axes are independent output tiles -> shardable across v7x's 2 TCs.
            dimension_semantics=("parallel", "parallel"),
            # Headroom above v5e's 16 MiB scoped default; safe on v6e/v7x too.
            vmem_limit_bytes=32 * 1024 * 1024,
        ),
    )(w_mat, x_flat)

    return out_flat[:, :, :hw].reshape(n, c_out, h, w)


if __name__ == "__main__":
    # Small shapes consistent with the module's forward (NCHW input).
    N, C_IN, C_OUT, H, W = 2, 4, 8, 16, 16

    key = jax.random.PRNGKey(0)
    kx, kw = jax.random.split(key)

    x = jax.random.normal(kx, (N, C_IN, H, W), dtype=jnp.float32)
    # Conv2d weight shape: (out_channels, in_channels, 1, 1).
    fan_in = C_IN  # kernel is 1x1
    bound = 1.0 / jnp.sqrt(fan_in)
    weight = jax.random.uniform(
        kw, (C_OUT, C_IN, 1, 1), minval=-bound, maxval=bound, dtype=jnp.float32
    )

    out = conv1x1(x, weight)
    out = jax.block_until_ready(out)

    # Reference in plain JAX (contract over the input-channel axis).
    ref = jnp.einsum("nchw,oc->nohw", x, weight[:, :, 0, 0])
    assert out.shape == (N, C_OUT, H, W)
    assert jnp.allclose(out, ref, atol=1e-5, rtol=1e-5)

    print("KERNEL_OK")
</pallas_src>

<mosaic_0001>
module attributes {stable_mosaic.version = 11 : i64} {
  func.func @_conv1x1_kernel(%arg0: i32, %arg1: i32, %arg2: memref<8x4xf32, #tpu.memory_space<vmem>>, %arg3: memref<1x4x256xf32, #tpu.memory_space<vmem>>, %arg4: memref<1x8x256xf32, #tpu.memory_space<vmem>>) attributes {dimension_semantics = [#tpu.dimension_semantics<parallel>, #tpu.dimension_semantics<parallel>], iteration_bounds = array<i64: 2, 1>, scalar_prefetch = 0 : i64, scratch_operands = 0 : i64, tpu.core_type = #tpu.core_type<tc>, window_params = [{pipeline_mode = #tpu.pipeline_mode<synchronous>, transform_indices = @transform_0, window_bounds = array<i64: 8, 4>}, {transform_indices = @transform_1, window_bounds = array<i64: 1, 4, 256>}, {transform_indices = @transform_2, window_bounds = array<i64: 1, 8, 256>}]} {
    %c0 = arith.constant 0 : index
    %c0_0 = arith.constant 0 : index
    %0 = vector.load %arg2[%c0, %c0_0] : memref<8x4xf32, #tpu.memory_space<vmem>>, vector<8x4xf32>
    %c0_1 = arith.constant 0 : index
    %c0_2 = arith.constant 0 : index
    %c0_3 = arith.constant 0 : index
    %1 = vector.load %arg3[%c0_1, %c0_2, %c0_3] : memref<1x4x256xf32, #tpu.memory_space<vmem>>, vector<1x4x256xf32>
    %2 = vector.shape_cast %1 : vector<1x4x256xf32> to vector<4x256xf32>
    %cst = arith.constant dense<0.000000e+00> : vector<8x256xf32>
    %3 = tpu.matmul %0, %2, %cst {dimension_numbers = #tpu.dot_dimension_numbers<[1], [0], [0], [1], [0, 0, 1, 1], [], []>} : vector<8x4xf32>, vector<4x256xf32>, vector<8x256xf32> -> vector<8x256xf32>
    %c0_4 = arith.constant 0 : index
    %c0_5 = arith.constant 0 : index
    %c0_6 = arith.constant 0 : index
    %4 = vector.load %arg4[%c0_4, %c0_5, %c0_6] : memref<1x8x256xf32, #tpu.memory_space<vmem>>, vector<1x8x256xf32>
    %5 = vector.shape_cast %4 : vector<1x8x256xf32> to vector<8x256xf32>
    %6 = vector.shape_cast %3 : vector<8x256xf32> to vector<1x8x256xf32>
    tpu.vector_store %arg4[%c0_4, %c0_5, %c0_6], %6 {strides = array<i32>} : memref<1x8x256xf32, #tpu.memory_space<vmem>>, vector<1x8x256xf32>,
    return
  }
  func.func @transform_0(%arg0: i32, %arg1: i32) -> (i32, i32) {
    %c0_i32 = arith.constant 0 : i32
    %c0_i32_0 = arith.constant 0 : i32
    %c0_i32_1 = arith.constant 0 : i32
    return %c0_i32, %c0_i32_0 : i32, i32
  }
  func.func @transform_1(%arg0: i32, %arg1: i32) -> (i32, i32, i32) {
    %c0_i32 = arith.constant 0 : i32
    %c0_i32_0 = arith.constant 0 : i32
    return %arg0, %c0_i32, %arg1 : i32, i32, i32
  }
  func.func @transform_2(%arg0: i32, %arg1: i32) -> (i32, i32, i32) {
    %c0_i32 = arith.constant 0 : i32
    %c0_i32_0 = arith.constant 0 : i32
    return %arg0, %c0_i32, %arg1 : i32, i32, i32
  }
}

</mosaic_0001>

<bundles_post_ra>
// kernel: tpu_custom_call.1
= control target key start
LH: loop header
LB: loop body
LE: loop exit
PB: predicated region body
PF: predicated region fallthrough
CT: control target
= control target key end

     0   :  { %7 = vsyncpa [#allocation3], 0  ;;  %s759_s0 = inlined_call_operand.vmem [shape: f32[8,4], index: 0, kind: input, shape index: {}]   ;;  %s760_s1 = inlined_call_operand.hbm [shape: f32[2,4,256], index: 1, kind: input, shape index: {}]   ;;  %s761_s2 = inlined_call_operand.hbm [shape: f32[2,8,256], index: 2, kind: output, shape index: {}]  }
   0x1   :  { %9 = vsyncpa [#allocation3 + $0x1], 0 }
   0x2   :  { %10 = vsyncpa [#allocation4], 0 }
   0x3   :  { %12 = vsyncpa [#allocation4 + $0x1], 0  ;;  %s583_s9 = smov 0   ;;  %s585_s10 = smov 0  }
   0x4   :  { %s587_s11 = smov 0   ;;  %s589_s12 = smov 0  }
   0x5   :  { %s591_s13 = smov 0   ;;  %s593_s14 = smov 0  }
   0x6 LB: > { %s367_s15 = sadd.s32 4294967295, %s563_s14   ;;  %s368_s16 = sadd.s32 4294967294, %s563_s14   ;;  %s563_s14 = sphi %s593_s14, %s18_s14   ;;  %s559_s13 = sphi %s591_s13, %s777_s13   ;;  %s555_s12 = sphi %s589_s12, %s776_s12   ;;  %s551_s11 = sphi %s587_s11, %s775_s11   ;;  %s547_s10 = sphi %s585_s10, %s774_s10   ;;  %s543_s9 = sphi %s583_s9, %s773_s9  }
   0x7   : > { %s30_s17 = sadd.s32 1, %s559_s13  ;;  %s60_s18 = sadd.s32 1, %s551_s11 }
   0x8   : > { %p32_p0 = scmp.ge.s32.totalorder %s30_s17, 2  ;;  %p67_p1 = scmp.ne.s32.totalorder %s551_s11, %s547_s10 }
   0x9   : > { %p68_p2 = scmp.eq.s32.totalorder %s563_s14, 0  ;;  %p73_p3 = scmp.ne.s32.totalorder %s547_s10, %s543_s9 }
   0xa   : > { %s779_s17 = smov (%p32_p0, %s30_s17), 0  ;;  %p74_p5 = scmp.eq.s32.totalorder %s367_s15, 0 }
   0xb   : > { %p624_p4 = por %p68_p2, %p67_p1  ;;  %s55_s20 = ssub.s32 %s559_s13, %s779_s17 }
   0xc   : > { %p99_p6 = scmp.eq.s32.totalorder %s367_s15, 1  ;;  %p58_p7 = scmp.eq.s32.totalorder %s55_s20, 0 }
   0xd   : > { %p630_p8 = por %p74_p5, %p73_p3  ;;  %p105_p10 = scmp.eq.s32.totalorder %s368_s16, 1 }
   0xe   : > { %p634_p9 = por %p99_p6, %p67_p1  ;;  %p399_p13 = scmp.lt.s32.totalorder %s563_s14, 2 }
   0xf   : > { %s639_s23 = scalar_select %p58_p7, %s551_s11, %s60_s18  }
  0x10   : > { %s765_s22 = scalar_select %p634_p9, 1, 0 }
  0x11   : > { %p641_p11 = por %p105_p10, %p73_p3  ;;  %s128_s25 = sand.u32 1, %s551_s11  }
  0x12   : > { %s371_s26 = sshll.u32 %s128_s25, 3  ;;  %s385_s27 = sshll.u32 %s559_s13, 7 }
  0x13   : > { %s766_s24 = scalar_select %p641_p11, 1, 0 }
  0x14   : > { %s652_s30 = scalar_lea.hbm %s760_s1, %s385_s27  ;;  %s132_s3 = scalar_lea.vmem [#allocation2], %s371_s26 }
  0x15   : > { %s142_s4 = sshll.u32 %s132_s3, 4  ;;  %p658_p0 = pnand %p399_p13, %p624_p4  ;;  %s654_s4 = int_to_ptr.vmem [resolvable:$true] %s142_s4 }
  0x16   : > { %s129_s6 = scalar_lea.sflag [#allocation3], %s128_s25  ;;  %s451_s7 = scalar_lea.hbm %s652_s30, 128 }
  0x17   : > { %p452_p3 = scmp.ne.s32.totalorder %s652_s30, %s451_s7  ;;  %p453_p5 = pneg %p658_p0 }
  0x18   : > { %s456_s16 = scalar_lea.hbm %s760_s1, 256  ;;  %p457_p4 = scmp.lt.u32.totalorder %s652_s30, %s760_s1 }
  0x19   : > { %p454_p6 = pnand %p453_p5, %p452_p3  ;;  %p458_p10 = scmp.lt.u32.totalorder %s456_s16, %s451_s7 }
  0x1a   : > { %p460_p12 = scmp.lt.u32.totalorder %s451_s7, %s652_s30 }
  0x1b   : > { %p455_p7 = pneg %p454_p6  ;;  %p459_p13 = por %p458_p10, %p457_p4 }
  0x1d   : > { %p461_p1 = por %p460_p12, %p459_p13 }
  0x1f   : > { %p462_p2 = pnand %p461_p1, %p455_p7 }
  0x21   : > { %465 = shalt.err (!%p462_p2)
}
  0x22   : > { %s466_s20 = scalar_lea.vmem %s654_s4, 128  ;;  %s565_s25 = smov [#allocation2]  }
  0x23   : > { %p467_p3 = scmp.ne.s32.totalorder %s654_s4, %s466_s20  ;;  %s471_s26 = sshll.u32 %s565_s25, 4  ;;  %s472_s26 = int_to_ptr.vmem [resolvable:$false] %s471_s26 }
  0x24   : > { %s473_s27 = scalar_lea.vmem %s472_s26, 256  ;;  %p474_p9 = scmp.lt.s32.totalorder %s654_s4, %s472_s26 }
  0x25   : > { %p469_p6 = pnand %p467_p3, %p453_p5  ;;  %p475_p4 = scmp.lt.s32.totalorder %s473_s27, %s466_s20 }
  0x27   : > { %p470_p11 = pneg %p469_p6  ;;  %p476_p10 = por %p475_p4, %p474_p9 }
  0x29   : > { %p477_p12 = pnand %p476_p10, %p470_p11 }
  0x2b   : > { %480 = shalt.err (!%p477_p12)
}
  0x2c   : > { %394 = dma.hbm_to_vmem [thread:$0]  (!%p658_p0), %s652_s30, 128, %s654_s4, %s129_s6  }
  0x2d   : > { %p768_p1 = scmp.lt.s32.totalorder %s563_s14, 3  ;;  %p769_p2 = scmp.ge.s32.totalorder %s563_s14, 1 }
  0x2f   : > { %p148_p5 = pnand %p769_p2, %p768_p1 }
  0x30   : > { %s694_s28 = sand.u32 (!%p148_p5), 1, %s547_s10  }
  0x31   : > { %151 = sbr.rel (%p148_p5) target bundleno = 289 (0x121), region = 28  ;;  %s375_s29 = sshll.u32 (!%p148_p5), %s694_s28, 3 }
  0x32   : > { %s154_s3 = scalar_lea.sflag (!%p148_p5), [#allocation3], %s694_s28  ;;  %s157_s7 = scalar_lea.vmem (!%p148_p5), [#allocation2], %s375_s29 }
  0x38   : > { %534 = dma.done.wait (%p630_p8), %s154_s3, 128  }
  0x39   : > { %536 = vsyncadd (%p630_p8), %s154_s3, 4294967168  ;;  %v566_v0 = vmov 0.0   ;;  %v181_v1 = vld [vmem:[%s157_s7] sm:$0xff]  ;;  %vm188_vm0 = vcmask 1043456   ;;  %vm184_vm1 = vcmask 31744   ;;  %s376_s5 = sshll.u32 %s694_s28, 4 }
  0x3a   : > { %257 = vmatprep.mubr.f32.mxu0 %v566_v0  ;;  %v183_v2 = vcombine.high %v181_v1, %v181_v1  ;;  %v180_v3 = vld [vmem:[%s759_s0] sm:$0xff]  ;;  %s177_s21 = scalar_lea.vmem [#allocation5], %s376_s5  ;;  %s386_s8 = sshll.u32 %s555_s12, 8 }
  0x3b   : > { %s283_s6 = sshll.u32 %s177_s21, 4  ;;  %s712_s18 = scalar_lea.hbm %s761_s2, %s386_s8  ;;  %s707_s6 = int_to_ptr.vmem [resolvable:$true] %s283_s6 }
  0x3c   : > { %377 = vmatprep.subr.msk.mxu0 %vm188_vm0, %v183_v2  ;;  %s267_s19 = scalar_lea.sflag [#allocation4], %s694_s28  ;;  %s481_s20 = scalar_lea.vmem %s707_s6, 256 }
  0x3d   : > { %378 = vmatpush1.msk.msra.mxu0 %vm188_vm0, %v181_v1  ;;  %p482_p8 = scmp.ne.s32.totalorder %s707_s6, %s481_s20  ;;  %p770_p9 = scmp.ne.s32.totalorder %s765_s22, 0 }
  0x3e   : > { %379 = vmatmul.mubr.msk.f32.vlgmr.msra.gmra.mrb[0].mxu0 %vm184_vm1, %v180_v3  ;;  %s567_s12 = smov [#allocation5]  }
  0x3f   : > { %p483_p11 = pnand %p482_p8, %p770_p9  ;;  %s485_s25 = sshll.u32 %s567_s12, 4  ;;  %s486_s25 = int_to_ptr.vmem [resolvable:$false] %s485_s25 }
  0x40   : > { %s487_s26 = scalar_lea.vmem %s486_s25, 512  ;;  %p488_p7 = scmp.lt.s32.totalorder %s707_s6, %s486_s25 }
  0x41   : > { %p484_p0 = pneg %p483_p11  ;;  %p489_p13 = scmp.lt.s32.totalorder %s487_s26, %s481_s20 }
  0x43   : > { %p490_p3 = por %p489_p13, %p488_p7 }
  0x45   : > { %p491_p6 = pnand %p490_p3, %p484_p0 }
 0x111   : > { %v259_v4 = vpop.f32.mrb[0].mxu0 }
 0x112   : > { %264 = vst [vmem:[%s177_s21] sm:$0xff] %v259_v4  ;;  %v261_v5 = vpop.f32.mrb[1].mxu0 }
 0x113   : > { %265 = vst [vmem:[%s177_s21 + $0x8] sm:$0xff] %v261_v5 }
 0x114   : > { %494 = shalt.err (!%p491_p6)
}
 0x115   : > { %s495_s27 = scalar_lea.hbm %s712_s18, 256  ;;  %s499_s3 = scalar_lea.hbm %s761_s2, 512 }
 0x116   : > { %p496_p4 = scmp.ne.s32.totalorder %s712_s18, %s495_s27  ;;  %p500_p1 = scmp.lt.u32.totalorder %s712_s18, %s761_s2 }
 0x117   : > { %p501_p2 = scmp.lt.u32.totalorder %s499_s3, %s495_s27  ;;  %p503_p8 = scmp.lt.u32.totalorder %s495_s27, %s712_s18 }
 0x118   : > { %p497_p10 = pnand %p496_p4, %p770_p9 }
 0x119   : > { %p502_p5 = por %p501_p2, %p500_p1 }
 0x11a   : > { %p498_p12 = pneg %p497_p10 }
 0x11b   : > { %p504_p11 = por %p503_p8, %p502_p5 }
 0x11d   : > { %p505_p0 = pnand %p504_p11, %p498_p12 }
 0x11f   : > { %508 = shalt.err (!%p505_p0)
}
 0x120   : > { %389 = dma.vmem_to_hbm [thread:$0]  (%p770_p9), %s707_s6, 256, %s712_s18, %s267_s19  }
 0x121 PF: > { %s295_s4 = sand.u32 1, %s543_s9   ;;  %p771_p7 = scmp.ne.s32.totalorder %s766_s24, 0 }
 0x122   : > { %p772_p13 = scmp.ge.s32.totalorder %s563_s14, 2  ;;  %s296_s5 = scalar_lea.sflag [#allocation4], %s295_s4 }
 0x124   : > { %p396_p3 = pnand %p772_p13, %p771_p7 }
 0x126   : > { %538 = dma.done.wait (!%p396_p3), %s296_s5, 256  }
 0x127   : > { %540 = vsyncadd (!%p396_p3), %s296_s5, 4294967040  ;;  %s18_s14 = sadd.s32 1, %s563_s14   ;;  %s773_s9 = smov %s547_s10 }
 0x128   : > { %p15_p6 = scmp.ge.s32.totalorder %s18_s14, 4   ;;  %s774_s10 = smov %s551_s11 }
 0x129   : > { %s775_s11 = smov %s639_s23  ;;  %s776_s12 = smov %s559_s13 }
 0x12a   : > { %s777_s13 = smov %s779_s17  ;;  %17 = sbr.rel (!%p15_p6) target bundleno = 6 (0x6), region = 73 }
 0x131   :  { %301 = vsyncpa [#allocation3], 1 }
 0x132   :  { %303 = vsyncpa [#allocation3 + $0x1], 1 }
 0x133   :  { %304 = vsyncpa [#allocation4], 1 }
 0x134   :  { %306 = vsyncpa [#allocation4 + $0x1], 1 }

</bundles_post_ra>
